<compile_context>
chip_gen: v7x
topology: tpu7x:2x2x1
jax: 0.10.0
libtpu: 0.0.40
codegen_flags: <defaults>
</compile_context>

<pallas_src>
import functools

import jax
import jax.numpy as jnp
from jax.experimental import pallas as pl
from jax.experimental.pallas import tpu as pltpu

BN_EPS = 1e-5
LEAKY_SLOPE = 0.01


def _leaky_relu(x, slope=LEAKY_SLOPE):
    return jnp.where(x > 0, x, slope * x)


# ---------------------------------------------------------------------------
# Pass 1: Linear1 + LeakyReLU, stage h, accumulate BN sum / sum-of-squares.
# ---------------------------------------------------------------------------
def _stage_stats_kernel(x_ref, w1_ref, b1_ref,
                        h_ref, sum_ref, sumsq_ref,
                        *, n_valid, tile_b, compute_dtype):
    i = pl.program_id(0)

    @pl.when(i == 0)
    def _():
        sum_ref[...] = jnp.zeros_like(sum_ref)
        sumsq_ref[...] = jnp.zeros_like(sumsq_ref)

    x = x_ref[...].astype(compute_dtype)
    w1 = w1_ref[...].astype(compute_dtype)
    h = jnp.dot(x, w1, preferred_element_type=jnp.float32) + b1_ref[...]
    h = _leaky_relu(h)

    # Mask batch-padding rows out of the statistics (only when padding exists).
    if n_valid % tile_b != 0:
        row = i * tile_b + jax.lax.broadcasted_iota(jnp.int32, (tile_b, 1), 0)
        hm = jnp.where(row < n_valid, h, 0.0)
    else:
        hm = h

    sum_ref[...] += jnp.sum(hm, axis=0, keepdims=True)
    sumsq_ref[...] += jnp.sum(hm * hm, axis=0, keepdims=True)
    h_ref[...] = h.astype(h_ref.dtype)


# ---------------------------------------------------------------------------
# Pass 2: folded BN affine + LeakyReLU + Linear2 (VPU mul + lane reduce) + Sigmoid.
# ---------------------------------------------------------------------------
def _bn_head_kernel(h_ref, scale_ref, shift_ref, w2_ref, b2_ref, o_ref):
    h = h_ref[...].astype(jnp.float32)
    h = h * scale_ref[...] + shift_ref[...]          # folded BN (one FMA)
    h = _leaky_relu(h)
    # N=1 "matmul" on VPU + XLU reduce instead of wasting the MXU.
    z = jnp.sum(h * w2_ref[...], axis=-1, keepdims=True) + b2_ref[0]
    o_ref[...] = jax.nn.sigmoid(z).astype(o_ref.dtype)


def discriminator_forward(x, params, *, tile_b=512,
                          compute_dtype=jnp.float32,
                          stage_dtype=jnp.float32):
    """x: (B, img_dim). params: dict from init_params (TPU-friendly layout).

    compute_dtype / stage_dtype can be set to bfloat16 to halve HBM traffic of
    the dominant operands; defaults stay float32 for exact PyTorch semantics.
    """
    B, D = x.shape
    H = params["w1"].shape[1]

    if tile_b >= B:
        tile_b = B                              # single full-extent batch tile
    else:
        tile_b = max(8, (tile_b // 8) * 8)      # sublane-aligned batch tile

    n_tiles = pl.cdiv(B, tile_b)
    B_pad = n_tiles * tile_b
    x_pad = jnp.pad(x, ((0, B_pad - B), (0, 0))) if B_pad != B else x

    st_bytes = jnp.dtype(stage_dtype).itemsize
    vmem_est = (2 * tile_b * D * x.dtype.itemsize          # double-buffered x tile
                + 2 * tile_b * H * st_bytes                # double-buffered staged h
                + D * H * params["w1"].dtype.itemsize      # resident w1
                + 16 * H * 4)                              # small (1,H) vectors
    vmem_limit = int(min(max(2 * vmem_est, 16 * 2 ** 20), 64 * 2 ** 20))

    # ---- Pass 1: stage h and accumulate global BN statistics ----
    kernel1 = functools.partial(_stage_stats_kernel, n_valid=B, tile_b=tile_b,
                                compute_dtype=compute_dtype)
    h_staged, h_sum, h_sumsq = pl.pallas_call(
        kernel1,
        grid=(n_tiles,),
        out_shape=(
            jax.ShapeDtypeStruct((B_pad, H), stage_dtype),
            jax.ShapeDtypeStruct((1, H), jnp.float32),
            jax.ShapeDtypeStruct((1, H), jnp.float32),
        ),
        in_specs=[
            pl.BlockSpec((tile_b, D), lambda i: (i, 0)),   # x tile (pipelined)
            pl.BlockSpec((D, H), lambda i: (0, 0)),        # w1: VMEM-resident
            pl.BlockSpec((1, H), lambda i: (0, 0)),        # b1: VMEM-resident
        ],
        out_specs=(
            pl.BlockSpec((tile_b, H), lambda i: (i, 0)),   # staged h
            pl.BlockSpec((1, H), lambda i: (0, 0)),        # sum accumulator
            pl.BlockSpec((1, H), lambda i: (0, 0)),        # sumsq accumulator
        ),
        compiler_params=pltpu.CompilerParams(
            dimension_semantics=("arbitrary",),            # cross-tile reduction
            vmem_limit_bytes=vmem_limit,
        ),
    )(x_pad, params["w1"], params["b1"])

    # ---- Fold BN (training-mode batch stats) into one per-feature FMA ----
    inv_b = 1.0 / B
    mean = h_sum * inv_b
    var = jnp.maximum(h_sumsq * inv_b - mean * mean, 0.0)   # biased batch var
    scale = params["gamma"] * jax.lax.rsqrt(var + BN_EPS)
    shift = params["beta"] - mean * scale

    # ---- Pass 2: normalize + LeakyReLU + Linear2 + Sigmoid ----
    out = pl.pallas_call(
        _bn_head_kernel,
        grid=(n_tiles,),
        out_shape=jax.ShapeDtypeStruct((B_pad, 1), jnp.float32),
        in_specs=[
            pl.BlockSpec((tile_b, H), lambda i: (i, 0)),   # staged h tile
            pl.BlockSpec((1, H), lambda i: (0, 0)),        # scale (resident)
            pl.BlockSpec((1, H), lambda i: (0, 0)),        # shift (resident)
            pl.BlockSpec((1, H), lambda i: (0, 0)),        # w2 row (resident)
            pl.BlockSpec((1,), lambda i: (0,),
                         memory_space=pltpu.MemorySpace.SMEM),  # b2 scalar
        ],
        out_specs=pl.BlockSpec((tile_b, 1), lambda i: (i, 0)),
        compiler_params=pltpu.CompilerParams(
            dimension_semantics=("parallel",),             # megacore on v7x
            vmem_limit_bytes=vmem_limit,
        ),
    )(h_staged, scale, shift, params["w2_row"], params["b2"])

    return out[:B] if B_pad != B else out


def init_params(key, img_dim, hidden=128):
    """Deterministic init mimicking nn.Linear defaults (uniform +-1/sqrt(fan_in))."""
    k1, k2, k3, k4 = jax.random.split(key, 4)
    bound1 = 1.0 / (img_dim ** 0.5)
    bound2 = 1.0 / (hidden ** 0.5)
    w1 = jax.random.uniform(k1, (img_dim, hidden), jnp.float32, -bound1, bound1)
    b1 = jax.random.uniform(k2, (1, hidden), jnp.float32, -bound1, bound1)
    w2_row = jax.random.uniform(k3, (1, hidden), jnp.float32, -bound2, bound2)
    b2 = jax.random.uniform(k4, (1,), jnp.float32, -bound2, bound2)
    gamma = jnp.ones((1, hidden), jnp.float32)   # BatchNorm1d weight init
    beta = jnp.zeros((1, hidden), jnp.float32)   # BatchNorm1d bias init
    return {"w1": w1, "b1": b1, "gamma": gamma, "beta": beta,
            "w2_row": w2_row, "b2": b2}


def reference_forward(x, params):
    h = x @ params["w1"] + params["b1"]
    h = jnp.where(h > 0, h, LEAKY_SLOPE * h)
    mean = jnp.mean(h, axis=0, keepdims=True)
    var = jnp.mean((h - mean) ** 2, axis=0, keepdims=True)
    h = (h - mean) * jax.lax.rsqrt(var + BN_EPS) * params["gamma"] + params["beta"]
    h = jnp.where(h > 0, h, LEAKY_SLOPE * h)
    z = h @ params["w2_row"].T + params["b2"][None, :]
    return jax.nn.sigmoid(z)


if __name__ == "__main__":
    # Small shapes; B=30 with tile_b=8 exercises multi-tile BN accumulation
    # AND the padded-row masking path (30 is not a multiple of 8).
    B, IMG_DIM, HIDDEN = 30, 64, 128
    key = jax.random.PRNGKey(0)
    kx, kp = jax.random.split(key)

    x = jax.random.normal(kx, (B, IMG_DIM), jnp.float32)
    params = init_params(kp, IMG_DIM, HIDDEN)

    fwd = jax.jit(functools.partial(discriminator_forward, tile_b=8))
    out = jax.block_until_ready(fwd(x, params))
    ref = jax.block_until_ready(reference_forward(x, params))

    assert out.shape == (B, 1), out.shape
    assert jnp.allclose(out, ref, atol=3e-5, rtol=3e-5), (out, ref)
    print("KERNEL_OK")
</pallas_src>

<mosaic_0001>
module attributes {stable_mosaic.version = 11 : i64} {
  func.func @_bn_head_kernel(%arg0: i32, %arg1: memref<8x128xf32, #tpu.memory_space<vmem>>, %arg2: memref<1x128xf32, #tpu.memory_space<vmem>>, %arg3: memref<1x128xf32, #tpu.memory_space<vmem>>, %arg4: memref<1x128xf32, #tpu.memory_space<vmem>>, %arg5: memref<1xf32, #tpu.memory_space<smem>>, %arg6: memref<8x1xf32, #tpu.memory_space<vmem>>) attributes {dimension_semantics = [#tpu.dimension_semantics<parallel>], iteration_bounds = array<i64: 4>, scalar_prefetch = 0 : i64, scratch_operands = 0 : i64, tpu.core_type = #tpu.core_type<tc>, window_params = [{transform_indices = @transform_0, window_bounds = array<i64: 8, 128>}, {pipeline_mode = #tpu.pipeline_mode<synchronous>, transform_indices = @transform_1, window_bounds = array<i64: 1, 128>}, {pipeline_mode = #tpu.pipeline_mode<synchronous>, transform_indices = @transform_2, window_bounds = array<i64: 1, 128>}, {pipeline_mode = #tpu.pipeline_mode<synchronous>, transform_indices = @transform_3, window_bounds = array<i64: 1, 128>}, {transform_indices = @transform_4, window_bounds = array<i64: 1>}, {transform_indices = @transform_5, window_bounds = array<i64: 8, 1>}]} {
    %c0 = arith.constant 0 : index
    %c0_0 = arith.constant 0 : index
    %0 = vector.load %arg1[%c0, %c0_0] : memref<8x128xf32, #tpu.memory_space<vmem>>, vector<8x128xf32>
    %c0_1 = arith.constant 0 : index
    %c0_2 = arith.constant 0 : index
    %1 = vector.load %arg2[%c0_1, %c0_2] : memref<1x128xf32, #tpu.memory_space<vmem>>, vector<1x128xf32>
    %2 = vector.broadcast %1 : vector<1x128xf32> to vector<8x128xf32>
    %3 = arith.mulf %0, %2 : vector<8x128xf32>
    %c0_3 = arith.constant 0 : index
    %c0_4 = arith.constant 0 : index
    %4 = vector.load %arg3[%c0_3, %c0_4] : memref<1x128xf32, #tpu.memory_space<vmem>>, vector<1x128xf32>
    %5 = vector.broadcast %4 : vector<1x128xf32> to vector<8x128xf32>
    %6 = arith.addf %3, %5 : vector<8x128xf32>
    %cst = arith.constant 0.000000e+00 : f32
    %7 = vector.broadcast %cst : f32 to vector<8x128xf32>
    %8 = arith.cmpf ogt, %6, %7 : vector<8x128xf32>
    %cst_5 = arith.constant 0.00999999977 : f32
    %9 = vector.broadcast %cst_5 : f32 to vector<8x128xf32>
    %10 = arith.mulf %9, %6 : vector<8x128xf32>
    %11 = arith.select %8, %6, %10 : vector<8x128xi1>, vector<8x128xf32>
    %c0_6 = arith.constant 0 : index
    %c0_7 = arith.constant 0 : index
    %12 = vector.load %arg4[%c0_6, %c0_7] : memref<1x128xf32, #tpu.memory_space<vmem>>, vector<1x128xf32>
    %13 = vector.broadcast %12 : vector<1x128xf32> to vector<8x128xf32>
    %14 = arith.mulf %11, %13 : vector<8x128xf32>
    %cst_8 = arith.constant dense<0.000000e+00> : vector<8xf32>
    %15 = vector.multi_reduction <add>, %14, %cst_8 [1] : vector<8x128xf32> to vector<8xf32>
    %16 = vector.shape_cast %15 : vector<8xf32> to vector<8x1xf32>
    %c0_9 = arith.constant 0 : index
    %17 = memref.load %arg5[%c0_9] : memref<1xf32, #tpu.memory_space<smem>>
    %18 = vector.broadcast %17 : f32 to vector<8x1xf32>
    %19 = arith.addf %16, %18 : vector<8x1xf32>
    %20 = arith.negf %19 : vector<8x1xf32>
    %21 = math.exp %20 : vector<8x1xf32>
    %cst_10 = arith.constant 1.000000e+00 : f32
    %22 = vector.broadcast %cst_10 : f32 to vector<8x1xf32>
    %23 = arith.addf %22, %21 : vector<8x1xf32>
    %24 = arith.divf %22, %23 : vector<8x1xf32>
    %c0_11 = arith.constant 0 : index
    %c0_12 = arith.constant 0 : index
    %25 = vector.load %arg6[%c0_11, %c0_12] : memref<8x1xf32, #tpu.memory_space<vmem>>, vector<8x1xf32>
    tpu.vector_store %arg6[%c0_11, %c0_12], %24 {strides = array<i32>} : memref<8x1xf32, #tpu.memory_space<vmem>>, vector<8x1xf32>,
    return
  }
  func.func @transform_0(%arg0: i32) -> (i32, i32) {
    %c0_i32 = arith.constant 0 : i32
    %c0_i32_0 = arith.constant 0 : i32
    return %arg0, %c0_i32 : i32, i32
  }
  func.func @transform_1(%arg0: i32) -> (i32, i32) {
    %c0_i32 = arith.constant 0 : i32
    %c0_i32_0 = arith.constant 0 : i32
    %c0_i32_1 = arith.constant 0 : i32
    return %c0_i32, %c0_i32_0 : i32, i32
  }
  func.func @transform_2(%arg0: i32) -> (i32, i32) {
    %c0_i32 = arith.constant 0 : i32
    %c0_i32_0 = arith.constant 0 : i32
    %c0_i32_1 = arith.constant 0 : i32
    return %c0_i32, %c0_i32_0 : i32, i32
  }
  func.func @transform_3(%arg0: i32) -> (i32, i32) {
    %c0_i32 = arith.constant 0 : i32
    %c0_i32_0 = arith.constant 0 : i32
    %c0_i32_1 = arith.constant 0 : i32
    return %c0_i32, %c0_i32_0 : i32, i32
  }
  func.func @transform_4(%arg0: i32) -> i32 {
    %c0_i32 = arith.constant 0 : i32
    %c0_i32_0 = arith.constant 0 : i32
    return %c0_i32 : i32
  }
  func.func @transform_5(%arg0: i32) -> (i32, i32) {
    %c0_i32 = arith.constant 0 : i32
    %c0_i32_0 = arith.constant 0 : i32
    return %arg0, %c0_i32 : i32, i32
  }
}

module attributes {stable_mosaic.version = 11 : i64} {
  func.func @_stage_stats_kernel(%arg0: i32, %arg1: memref<8x64xf32, #tpu.memory_space<vmem>>, %arg2: memref<64x128xf32, #tpu.memory_space<vmem>>, %arg3: memref<1x128xf32, #tpu.memory_space<vmem>>, %arg4: memref<8x128xf32, #tpu.memory_space<vmem>>, %arg5: memref<1x128xf32, #tpu.memory_space<vmem>>, %arg6: memref<1x128xf32, #tpu.memory_space<vmem>>) attributes {dimension_semantics = [#tpu.dimension_semantics<arbitrary>], iteration_bounds = array<i64: 4>, scalar_prefetch = 0 : i64, scratch_operands = 0 : i64, tpu.core_type = #tpu.core_type<tc>, window_params = [{transform_indices = @transform_0, window_bounds = array<i64: 8, 64>}, {pipeline_mode = #tpu.pipeline_mode<synchronous>, transform_indices = @transform_1, window_bounds = array<i64: 64, 128>}, {pipeline_mode = #tpu.pipeline_mode<synchronous>, transform_indices = @transform_2, window_bounds = array<i64: 1, 128>}, {transform_indices = @transform_3, window_bounds = array<i64: 8, 128>}, {pipeline_mode = #tpu.pipeline_mode<synchronous>, transform_indices = @transform_4, window_bounds = array<i64: 1, 128>}, {pipeline_mode = #tpu.pipeline_mode<synchronous>, transform_indices = @transform_5, window_bounds = array<i64: 1, 128>}]} {
    %c0_i32 = arith.constant 0 : i32
    %0 = arith.cmpi eq, %arg0, %c0_i32 : i32
    %1 = arith.extui %0 : i1 to i32
    %c0_i32_0 = arith.constant 0 : i32
    %2 = arith.cmpi ne, %1, %c0_i32_0 : i32
    scf.if %2 {
      %cst_21 = arith.constant 0.000000e+00 : f32
      %36 = vector.broadcast %cst_21 : f32 to vector<1x128xf32>
      %c0_22 = arith.constant 0 : index
      %c0_23 = arith.constant 0 : index
      %37 = vector.load %arg5[%c0_22, %c0_23] : memref<1x128xf32, #tpu.memory_space<vmem>>, vector<1x128xf32>
      tpu.vector_store %arg5[%c0_22, %c0_23], %36 {strides = array<i32>} : memref<1x128xf32, #tpu.memory_space<vmem>>, vector<1x128xf32>,
      %cst_24 = arith.constant 0.000000e+00 : f32
      %38 = vector.broadcast %cst_24 : f32 to vector<1x128xf32>
      %c0_25 = arith.constant 0 : index
      %c0_26 = arith.constant 0 : index
      %39 = vector.load %arg6[%c0_25, %c0_26] : memref<1x128xf32, #tpu.memory_space<vmem>>, vector<1x128xf32>
      tpu.vector_store %arg6[%c0_25, %c0_26], %38 {strides = array<i32>} : memref<1x128xf32, #tpu.memory_space<vmem>>, vector<1x128xf32>,
    } else {
    }
    %c0 = arith.constant 0 : index
    %c0_1 = arith.constant 0 : index
    %3 = vector.load %arg1[%c0, %c0_1] : memref<8x64xf32, #tpu.memory_space<vmem>>, vector<8x64xf32>
    %c0_2 = arith.constant 0 : index
    %c0_3 = arith.constant 0 : index
    %4 = vector.load %arg2[%c0_2, %c0_3] : memref<64x128xf32, #tpu.memory_space<vmem>>, vector<64x128xf32>
    %cst = arith.constant dense<0.000000e+00> : vector<8x128xf32>
    %5 = tpu.matmul %3, %4, %cst {dimension_numbers = #tpu.dot_dimension_numbers<[1], [0], [0], [1], [0, 0, 1, 1], [], []>} : vector<8x64xf32>, vector<64x128xf32>, vector<8x128xf32> -> vector<8x128xf32>
    %c0_4 = arith.constant 0 : index
    %c0_5 = arith.constant 0 : index
    %6 = vector.load %arg3[%c0_4, %c0_5] : memref<1x128xf32, #tpu.memory_space<vmem>>, vector<1x128xf32>
    %7 = vector.broadcast %6 : vector<1x128xf32> to vector<8x128xf32>
    %8 = arith.addf %5, %7 : vector<8x128xf32>
    %cst_6 = arith.constant 0.000000e+00 : f32
    %9 = vector.broadcast %cst_6 : f32 to vector<8x128xf32>
    %10 = arith.cmpf ogt, %8, %9 : vector<8x128xf32>
    %cst_7 = arith.constant 0.00999999977 : f32
    %11 = vector.broadcast %cst_7 : f32 to vector<8x128xf32>
    %12 = arith.mulf %11, %8 : vector<8x128xf32>
    %13 = arith.select %10, %8, %12 : vector<8x128xi1>, vector<8x128xf32>
    %c8_i32 = arith.constant 8 : i32
    %14 = arith.muli %arg0, %c8_i32 : i32
    %15 = tpu.iota {dimensions = array<i32: 0>} : vector<8x1xi32>
    %16 = vector.broadcast %14 : i32 to vector<8x1xi32>
    %17 = arith.addi %16, %15 : vector<8x1xi32>
    %c30_i32 = arith.constant 30 : i32
    %18 = vector.broadcast %c30_i32 : i32 to vector<8x1xi32>
    %19 = arith.cmpi slt, %17, %18 : vector<8x1xi32>
    %cst_8 = arith.constant 0.000000e+00 : f32
    %20 = vector.shape_cast %19 : vector<8x1xi1> to vector<8x1xi1>
    %21 = vector.broadcast %20 : vector<8x1xi1> to vector<8x128xi1>
    %22 = vector.broadcast %cst_8 : f32 to vector<8x128xf32>
    %23 = arith.select %21, %13, %22 : vector<8x128xi1>, vector<8x128xf32>
    %c0_9 = arith.constant 0 : index
    %c0_10 = arith.constant 0 : index
    %24 = vector.load %arg5[%c0_9, %c0_10] : memref<1x128xf32, #tpu.memory_space<vmem>>, vector<1x128xf32>
    %cst_11 = arith.constant dense<0.000000e+00> : vector<128xf32>
    %25 = vector.multi_reduction <add>, %23, %cst_11 [0] : vector<8x128xf32> to vector<128xf32>
    %26 = vector.shape_cast %25 : vector<128xf32> to vector<1x128xf32>
    %27 = arith.addf %24, %26 : vector<1x128xf32>
    %c0_12 = arith.constant 0 : index
    %c0_13 = arith.constant 0 : index
    %28 = vector.load %arg5[%c0_12, %c0_13] : memref<1x128xf32, #tpu.memory_space<vmem>>, vector<1x128xf32>
    tpu.vector_store %arg5[%c0_12, %c0_13], %27 {strides = array<i32>} : memref<1x128xf32, #tpu.memory_space<vmem>>, vector<1x128xf32>,
    %c0_14 = arith.constant 0 : index
    %c0_15 = arith.constant 0 : index
    %29 = vector.load %arg6[%c0_14, %c0_15] : memref<1x128xf32, #tpu.memory_space<vmem>>, vector<1x128xf32>
    %30 = arith.mulf %23, %23 : vector<8x128xf32>
    %cst_16 = arith.constant dense<0.000000e+00> : vector<128xf32>
    %31 = vector.multi_reduction <add>, %30, %cst_16 [0] : vector<8x128xf32> to vector<128xf32>
    %32 = vector.shape_cast %31 : vector<128xf32> to vector<1x128xf32>
    %33 = arith.addf %29, %32 : vector<1x128xf32>
    %c0_17 = arith.constant 0 : index
    %c0_18 = arith.constant 0 : index
    %34 = vector.load %arg6[%c0_17, %c0_18] : memref<1x128xf32, #tpu.memory_space<vmem>>, vector<1x128xf32>
    tpu.vector_store %arg6[%c0_17, %c0_18], %33 {strides = array<i32>} : memref<1x128xf32, #tpu.memory_space<vmem>>, vector<1x128xf32>,
    %c0_19 = arith.constant 0 : index
    %c0_20 = arith.constant 0 : index
    %35 = vector.load %arg4[%c0_19, %c0_20] : memref<8x128xf32, #tpu.memory_space<vmem>>, vector<8x128xf32>
    tpu.vector_store %arg4[%c0_19, %c0_20], %13 {strides = array<i32>} : memref<8x128xf32, #tpu.memory_space<vmem>>, vector<8x128xf32>,
    return
  }
  func.func @transform_0(%arg0: i32) -> (i32, i32) {
    %c0_i32 = arith.constant 0 : i32
    %c0_i32_0 = arith.constant 0 : i32
    return %arg0, %c0_i32 : i32, i32
  }
  func.func @transform_1(%arg0: i32) -> (i32, i32) {
    %c0_i32 = arith.constant 0 : i32
    %c0_i32_0 = arith.constant 0 : i32
    %c0_i32_1 = arith.constant 0 : i32
    return %c0_i32, %c0_i32_0 : i32, i32
  }
  func.func @transform_2(%arg0: i32) -> (i32, i32) {
    %c0_i32 = arith.constant 0 : i32
    %c0_i32_0 = arith.constant 0 : i32
    %c0_i32_1 = arith.constant 0 : i32
    return %c0_i32, %c0_i32_0 : i32, i32
  }
  func.func @transform_3(%arg0: i32) -> (i32, i32) {
    %c0_i32 = arith.constant 0 : i32
    %c0_i32_0 = arith.constant 0 : i32
    return %arg0, %c0_i32 : i32, i32
  }
  func.func @transform_4(%arg0: i32) -> (i32, i32) {
    %c0_i32 = arith.constant 0 : i32
    %c0_i32_0 = arith.constant 0 : i32
    %c0_i32_1 = arith.constant 0 : i32
    return %c0_i32, %c0_i32_0 : i32, i32
  }
  func.func @transform_5(%arg0: i32) -> (i32, i32) {
    %c0_i32 = arith.constant 0 : i32
    %c0_i32_0 = arith.constant 0 : i32
    %c0_i32_1 = arith.constant 0 : i32
    return %c0_i32, %c0_i32_0 : i32, i32
  }
}

</mosaic_0001>

<bundles_post_ra>
// kernel: discriminator_forward.3
= control target key start
LH: loop header
LB: loop body
LE: loop exit
PB: predicated region body
PF: predicated region fallthrough
CT: control target
= control target key end

     0   :  { %s381_s20 = smov 0   ;;  %s407_s0 = inlined_call_operand.vmem [shape: f32[32,128], index: 0, kind: input, shape index: {}]   ;;  %s408_s1 = inlined_call_operand.vmem [shape: f32[1,128], index: 1, kind: input, shape index: {}]   ;;  %s409_s2 = inlined_call_operand.vmem [shape: f32[1,128], index: 2, kind: input, shape index: {}]   ;;  %s410_s3 = inlined_call_operand.vmem [shape: f32[1,128], index: 3, kind: input, shape index: {}]   ;;  %s411_s4 = inlined_call_operand.<no memory space> [shape: f32[1], index: 4, kind: input, shape index: {}]   ;;  %s412_s5 = inlined_call_operand.vmem [shape: f32[32,1], index: 5, kind: output, shape index: {}]  }
   0x1   :  { %10 = sst [smem:[#allocation2]] %s411_s4 }
   0x2 LB: > { %s315_s21 = sadd.s32 4294967295, %s346_s20   ;;  %p319_p0 = scmp.ge.s32.totalorder %s346_s20, 1  ;;  %s346_s20 = sphi %s381_s20, %s16_s20  }
   0x3   : > { %p187_p1 = scmp.lt.s32.totalorder %s346_s20, 5 }
   0x5   : > { %p188_p2 = pnand %p319_p0, %p187_p1 }
   0x6   : > { %p213_p3 = scmp.lt.s32.totalorder (!%p188_p2), %s315_s21, 3  ;;  %v322_v0 = vld [vmem:[%s408_s1] ss:$0 sm:$0xff] (!%p188_p2)  ;;  %s251_s6 = sld [smem:[#allocation2]] (!%p188_p2)  ;;  %vm260_vm1 = vcmask (!%p188_p2), 7168  }
   0x7   : > { %191 = sbr.rel (%p188_p2) target bundleno = 198 (0xc6), region = 40  ;;  %v323_v2 = vld [vmem:[%s409_s2] ss:$0 sm:$0xff] (!%p188_p2) }
   0x8   : > { %v324_v6 = vld [vmem:[%s410_s3] ss:$0 sm:$0xff] (!%p188_p2) }
   0xc   : > { %v252_v9 = vstv (!%p188_p2), %s251_s6 }
   0xe   : > { %s414_s21 = smov (!%p213_p3, %s315_s21), 3 }
   0xf   : > { %s320_s22 = sshll.u32 %s414_s21, 3 }
  0x10   : > { %s216_s26 = scalar_lea.vmem %s407_s0, %s320_s22  ;;  %s220_s9 = scalar_lea.vmem %s412_s5, %s320_s22 }
  0x11   : > { %v221_v1 = vld [vmem:[%s216_s26] sm:$0xff] }
  0x12   : > { %v229_v3 = vmul.f32 %v322_v0, %v221_v1 }
  0x14   : > { %v237_v4 = vadd.f32 %v323_v2, %v229_v3 }
  0x16   : > { %vm238_vm0 = vcmp.gt.f32.partialorder %v237_v4, 0.0  ;;  %v239_v5 = vmul.f32 0.01, %v237_v4 }
  0x18   : > { %v240_v7 = vsel %vm238_vm0, %v237_v4, %v239_v5 }
  0x19   : > { %v248_v8 = vmul.f32 %v324_v6, %v240_v7 }
  0x1b   : > { %249 = vadd.xlane.f32.xlu0 %v248_v8 }
  0xa8   : > { %v250_v10 = vpop.xlane.xlu0 %249 }
  0xa9   : > { %v253_v11 = vadd.f32 %v252_v9, %v250_v10 }
  0xab   : > { %v325_v12 = vmul.f32 -1.442695, %v253_v11 }
  0xad   : > { %336 = vpow2.f32 %v325_v12 }
  0xb7   : > { %v337_v13 = vpop.eup %336 }
  0xb8   : > { %v257_v14 = vadd.f32 1.0, %v337_v13 }
  0xba   : > { %338 = vrcp.f32 %v257_v14 }
  0xc4   : > { %v339_v15 = vpop.eup %338 }
  0xc5   : > { %261 = vst.msk [vmem:[%s220_s9] sm:$0xff] %vm260_vm1, %v339_v15 }
  0xc6 PF: > { %s16_s20 = sadd.s32 1, %s346_s20  }
  0xc7   : > { %p13_p4 = scmp.ge.s32.totalorder %s16_s20, 6  }
  0xc9   :  { %15 = sbr.rel (!%p13_p4) target bundleno = 2 (0x2), region = 70 }

// kernel: discriminator_forward.2
= control target key start
LH: loop header
LB: loop body
LE: loop exit
PB: predicated region body
PF: predicated region fallthrough
CT: control target
= control target key end

     0   :  { %s515_s18 = smov 0   ;;  %s589_s0 = inlined_call_operand.vmem [shape: f32[32,64], index: 0, kind: input, shape index: {}]   ;;  %s590_s1 = inlined_call_operand.vmem [shape: f32[64,128], index: 1, kind: input, shape index: {}]   ;;  %s591_s2 = inlined_call_operand.vmem [shape: f32[1,128], index: 2, kind: input, shape index: {}]   ;;  %s592_s3 = inlined_call_operand.vmem [shape: f32[32,128], index: 3, kind: output, shape index: {0}]   ;;  %s593_s4 = inlined_call_operand.vmem [shape: f32[1,128], index: 4, kind: output, shape index: {1}]   ;;  %s594_s5 = inlined_call_operand.vmem [shape: f32[1,128], index: 5, kind: output, shape index: {2}]  }
   0x1 LB: > { %s521_s19 = sadd.s32 4294967295, %s479_s18   ;;  %p412_p0 = scmp.ge.s32.totalorder %s479_s18, 1  ;;  %s479_s18 = sphi %s515_s18, %s16_s18  }
   0x2   : > { %p181_p1 = scmp.lt.s32.totalorder %s479_s18, 5 }
   0x4   : > { %p182_p2 = pnand %p412_p0, %p181_p1 }
   0x5   : > { %p207_p3 = scmp.lt.s32.totalorder (!%p182_p2), %s521_s19, 3  ;;  %p415_p4 = scmp.ne.s32.totalorder (!%p182_p2), %s521_s19, 0 }
   0x6   : > { %185 = sbr.rel (%p182_p2) target bundleno = 274 (0x112), region = 32 }
   0xd   : > { %s208_s20 = scalar_select %p207_p3, %s521_s19, 3 }
   0xe   : > { %218 = sbr.rel (%p415_p4) target bundleno = 21 (0x15), region = 36  ;;  %v481_v0 = vmov (!%p415_p4), 0.0  }
   0xf   : > { %s413_s21 = sshll.u32 %s208_s20, 3  ;;  %219 = vst [vmem:[%s593_s4] sm:$0x1] (!%p415_p4), %v481_v0  ;;  %220 = vst [vmem:[%s594_s5] sm:$0x1] (!%p415_p4), %v481_v0 }
  0x10   : > { %s530_s24 = scalar_lea.vmem %s589_s0, %s413_s21  ;;  %s535_s27 = scalar_lea.vmem %s592_s3, %s413_s21 }
  0x15 PF: > { %v222_v1 = vld [vmem:[%s590_s1] sm:$0xff]  ;;  %v223_v2 = vld [vmem:[%s590_s1 + $0x8] sm:$0xff]  ;;  %v224_v3 = vld [vmem:[%s590_s1 + $0x10] sm:$0xff]  ;;  %v482_v4 = vmov 0.0|0.0   ;;  %vm483_vm0 = vmmov 0   ;;  %v484_v7 = vmov 0.0   ;;  %v315_v16 = vlaneseq }
  0x16   : > { %449 = vmatprep.subr.bf16.mxu0 %v482_v4  ;;  %v450_v5 = vpack.c.bf16 %v223_v2, %v222_v1  ;;  %v225_v6 = vld [vmem:[%s590_s1 + $0x18] sm:$0xff]  ;;  %446 = vmatprep.mubr.msk.f32.mxu0 %vm483_vm0, %v484_v7  ;;  %v226_v9 = vld [vmem:[%s590_s1 + $0x20] sm:$0xff]  ;;  %v227_v10 = vld [vmem:[%s590_s1 + $0x28] sm:$0xff]  ;;  %vm237_vm1 = vcmask 523264   ;;  %s418_s26 = sshll.u32 %s521_s19, 3 }
  0x17   : > { %v453_v8 = vpack.c.bf16 %v225_v6, %v224_v3  ;;  %v456_v11 = vpack.c.bf16 %v227_v10, %v226_v9  ;;  %v228_v12 = vld [vmem:[%s590_s1 + $0x30] sm:$0xff]  ;;  %v229_v13 = vld [vmem:[%s590_s1 + $0x38] sm:$0xff]  ;;  %v221_v15 = vld [vmem:[%s530_s24] sm:$0xff]  ;;  %v316_v17 = vshrl.u32 %v315_v16, 7  ;;  %v317_v18 = vstv %s418_s26 }
  0x18   : > { %451 = vmatpush3.bf16.msra.mxu0 %v450_v5  ;;  %v459_v14 = vpack.c.bf16 %v229_v13, %v228_v12  ;;  %v416_v19 = vld [vmem:[%s591_s2] ss:$0 sm:$0xff] }
  0x19   : > { %452 = vmatprep.subr.bf16.mxu0 %v482_v4  ;;  %v318_v20 = vadd.s32 %v317_v18, %v316_v17  ;;  %v323_v37 = vld [vmem:[%s593_s4] sm:$0x1] }
  0x1a   : > { %v332_v40 = vld [vmem:[%s594_s5] sm:$0x1] }
  0x1b   : > { %vm319_vm3 = vcmp.lt.s32.totalorder %v318_v20, 30 }
  0x1c   : > { %454 = vmatpush3.bf16.msra.mxu0 %v453_v8 }
  0x1d   : > { %455 = vmatprep.subr.bf16.mxu0 %v482_v4 }
  0x20   : > { %457 = vmatpush3.bf16.msra.mxu0 %v456_v11 }
  0x21   : > { %458 = vmatprep.subr.bf16.mxu0 %v482_v4 }
  0x24   : > { %460 = vmatpush3.bf16.msra.mxu0 %v459_v14 }
  0x27   : > { %447 = vmatmul.mubr.msk.f32.vlgmr.msra.gmra.mrb[0].mxu0 %vm237_vm1, %v221_v15 }
  0xfa   : > { %v307_v21 = vpop.f32.mrb[0].mxu0 }
  0xfb   : > { %v308_v22 = vadd.f32 %v416_v19, %v307_v21  ;;  %v448_v23 = vpop.f32.mrb[1].mxu0 }
  0xfd   : > { %vm311_vm2 = vcmp.gt.f32.partialorder %v308_v22, 0.0  ;;  %v312_v24 = vmul.f32 0.01, %v308_v22 }
  0xff   : > { %v313_v25 = vsel %vm311_vm2, %v308_v22, %v312_v24 }
 0x100   : > { %v322_v26 = vsel %vm319_vm3, %v313_v25, 0.0  ;;  %342 = vst [vmem:[%s535_s27] sm:$0xff] %v313_v25 }
 0x101   : > { %v324_v27 = vrot.slane %v322_v26, 4  ;;  %v333_v28 = vmul.f32 %v322_v26, %v322_v26 }
 0x103   : > { %v325_v29 = vadd.f32 %v324_v27, %v322_v26  ;;  %v334_v30 = vrot.slane %v333_v28, 4 }
 0x105   : > { %v326_v31 = vrot.slane %v325_v29, 2  ;;  %v335_v32 = vadd.f32 %v334_v30, %v333_v28 }
 0x107   : > { %v327_v33 = vadd.f32 %v326_v31, %v325_v29  ;;  %v336_v34 = vrot.slane %v335_v32, 2 }
 0x109   : > { %v328_v35 = vrot.slane %v327_v33, 1  ;;  %v337_v36 = vadd.f32 %v336_v34, %v335_v32 }
 0x10b   : > { %v329_v38 = vadd.f32 %v328_v35, %v327_v33  ;;  %v338_v39 = vrot.slane %v337_v36, 1 }
 0x10d   : > { %v330_v41 = vadd.f32 %v329_v38, %v323_v37  ;;  %v339_v42 = vadd.f32 %v338_v39, %v337_v36 }
 0x10f   : > { %331 = vst [vmem:[%s593_s4] sm:$0x1] %v330_v41  ;;  %v340_v43 = vadd.f32 %v339_v42, %v332_v40 }
 0x111   : > { %341 = vst [vmem:[%s594_s5] sm:$0x1] %v340_v43 }
 0x112 PF: > { %s16_s18 = sadd.s32 1, %s479_s18  }
 0x113   : > { %p13_p5 = scmp.ge.s32.totalorder %s16_s18, 6  }
 0x115   :  { %15 = sbr.rel (!%p13_p5) target bundleno = 1 (0x1), region = 82 }

</bundles_post_ra>
